<compile_context>
chip_gen: v5e
topology: v5e:2x2
jax: 0.10.0
libtpu: 0.0.40
codegen_flags: <defaults>
</compile_context>

<pallas_src>
import jax
import jax.numpy as jnp
from jax.experimental import pallas as pl
from jax.experimental.pallas import tpu as pltpu


def attention_kernel(dec_ref, enc_ref, mask_ref, w1_ref, w2_ref, vt_ref, out_ref):
    # dec_ref : (TB, H)      decoder_state block
    # enc_ref : (TB, S, H)   encoder_outputs block
    # mask_ref: (TB, S)      float mask (1 = valid, 0 = padding)
    # w1_ref  : (H, H) = W1.T    w2_ref : (H, H) = W2.T    vt_ref : (1, H)
    # out_ref : (TB, S)      masked log-softmax scores
    tb, s, h = enc_ref.shape

    # One fused MXU call over all TB*S encoder rows, f32 accumulation.
    enc = enc_ref[...].reshape(tb * s, h)
    enc_t = jnp.dot(enc, w1_ref[...], preferred_element_type=jnp.float32)

    # Decoder transform once per block (hoisted out of the per-row work).
    dec_t = jnp.dot(dec_ref[...], w2_ref[...], preferred_element_type=jnp.float32)

    hidden = jnp.tanh(enc_t.reshape(tb, s, h) + dec_t[:, None, :])      # (TB,S,H) f32

    # vt "matmul" (N=1) as a VPU multiply + XLU lane reduction.
    u = jnp.sum(hidden * vt_ref[...].astype(jnp.float32), axis=-1)      # (TB, S)

    # Masked log-softmax along the sequence axis (binary mask assumed).
    neg = jnp.float32(-1e30)          # effectively -inf but keeps the LSE finite
    logits = jnp.where(mask_ref[...] != 0, u, neg)
    m = jnp.max(logits, axis=-1, keepdims=True)
    lse = jnp.log(jnp.sum(jnp.exp(logits - m), axis=-1, keepdims=True)) + m
    out_ref[...] = (logits - lse).astype(out_ref.dtype)


def _choose_block_b(B, S):
    """Batch elements per grid step: fold ~256 rows into the MXU M dimension,
    keep the sublane dim a multiple of 8, and leave >= 2 grid steps for large B
    so v7x's two TensorCores both get work (also bounds VMEM per step)."""
    if B <= 8:
        return B
    rows_target = max(8, ((256 // max(S, 1)) // 8) * 8)
    block_b = min(rows_target, 8 * pl.cdiv(B, 16))   # >= 2 steps once B >= 16
    return max(8, min(block_b, B))


def ptr_attention(decoder_state, encoder_outputs, mask, W1, W2, vt, *, block_b=None):
    """decoder_state (B,H), encoder_outputs (B,S,H), mask (B,S);
    W1, W2 (H,H) and vt (1,H) in PyTorch nn.Linear (out,in) convention."""
    B, S, H = encoder_outputs.shape
    cdtype = encoder_outputs.dtype        # don't force f32: bf16 inputs stay MXU-native

    dec = decoder_state.astype(cdtype)
    enc = encoder_outputs
    msk = mask.astype(jnp.float32)
    w1_t = W1.T.astype(cdtype)            # (H, H): x @ W1.T
    w2_t = W2.T.astype(cdtype)            # (H, H)
    vt_row = vt.reshape(1, H).astype(jnp.float32)   # consumed on the VPU in f32

    if block_b is None:
        block_b = _choose_block_b(B, S)

    # Pad the batch so block_b divides it (padded rows are valid-masked, dropped below).
    Bp = pl.cdiv(B, block_b) * block_b
    if Bp != B:
        pad = Bp - B
        dec = jnp.pad(dec, ((0, pad), (0, 0)))
        enc = jnp.pad(enc, ((0, pad), (0, 0), (0, 0)))
        msk = jnp.pad(msk, ((0, pad), (0, 0)), constant_values=1.0)

    grid_spec = pltpu.PrefetchScalarGridSpec(
        num_scalar_prefetch=0,
        grid=(Bp // block_b,),
        in_specs=[
            pl.BlockSpec((block_b, H), lambda b: (b, 0)),        # decoder_state
            pl.BlockSpec((block_b, S, H), lambda b: (b, 0, 0)),  # encoder_outputs
            pl.BlockSpec((block_b, S), lambda b: (b, 0)),        # mask
            # Weights: constant block index -> same tile reused across the grid.
            pl.BlockSpec((H, H), lambda b: (0, 0)),              # W1^T
            pl.BlockSpec((H, H), lambda b: (0, 0)),              # W2^T
            pl.BlockSpec((1, H), lambda b: (0, 0)),              # vt row
        ],
        out_specs=pl.BlockSpec((block_b, S), lambda b: (b, 0)),
    )

    out = pl.pallas_call(
        attention_kernel,
        out_shape=jax.ShapeDtypeStruct((Bp, S), jnp.float32),
        grid_spec=grid_spec,
        compiler_params=pltpu.CompilerParams(
            # batch axis is embarrassingly parallel (megacore / v7x 2-TC sharding)
            dimension_semantics=("parallel",),
        ),
    )(dec, enc, msk, w1_t, w2_t, vt_row)

    return out[:B] if Bp != B else out


if __name__ == "__main__":
    B, S, H = 2, 8, 32
    key = jax.random.PRNGKey(0)
    k_dec, k_enc, k_w1, k_w2, k_vt = jax.random.split(key, 5)

    decoder_state = jax.random.normal(k_dec, (B, H), dtype=jnp.float32)
    encoder_outputs = jax.random.normal(k_enc, (B, S, H), dtype=jnp.float32)
    # mask: 1.0 for valid positions, 0.0 for padding (last two positions of batch 1)
    mask = jnp.ones((B, S), dtype=jnp.float32).at[1, S - 2:].set(0.0)

    # Deterministic params matching nn.Linear shapes (out_features, in_features)
    bound = 1.0 / (H ** 0.5)
    W1 = jax.random.uniform(k_w1, (H, H), jnp.float32, -bound, bound)
    W2 = jax.random.uniform(k_w2, (H, H), jnp.float32, -bound, bound)
    vt = jax.random.uniform(k_vt, (1, H), jnp.float32, -bound, bound)

    log_score = jax.block_until_ready(
        ptr_attention(decoder_state, encoder_outputs, mask, W1, W2, vt))

    # Reference check (plain JAX) on the valid (unmasked) positions.
    enc_t = encoder_outputs @ W1.T
    dec_t = (decoder_state @ W2.T)[:, None, :]
    u_ref = (jnp.tanh(enc_t + dec_t) @ vt.T)[..., 0]
    ref = jax.nn.log_softmax(jnp.where(mask != 0, u_ref, -1e30), axis=-1)
    valid = mask != 0
    assert log_score.shape == (B, S)
    assert bool(jnp.all(jnp.isfinite(log_score)))
    assert jnp.allclose(jnp.where(valid, log_score, 0.0),
                        jnp.where(valid, ref, 0.0), atol=1e-5, rtol=1e-5)
    print("KERNEL_OK")
</pallas_src>

<mosaic_0001>
module attributes {stable_mosaic.version = 11 : i64} {
  func.func @attention_kernel(%arg0: i32, %arg1: memref<2x32xf32, #tpu.memory_space<vmem>>, %arg2: memref<2x8x32xf32, #tpu.memory_space<vmem>>, %arg3: memref<2x8xf32, #tpu.memory_space<vmem>>, %arg4: memref<32x32xf32, #tpu.memory_space<vmem>>, %arg5: memref<32x32xf32, #tpu.memory_space<vmem>>, %arg6: memref<1x32xf32, #tpu.memory_space<vmem>>, %arg7: memref<2x8xf32, #tpu.memory_space<vmem>>) attributes {dimension_semantics = [#tpu.dimension_semantics<parallel>], iteration_bounds = array<i64: 1>, scalar_prefetch = 0 : i64, scratch_operands = 0 : i64, tpu.core_type = #tpu.core_type<tc>, window_params = [{transform_indices = @transform_0, window_bounds = array<i64: 2, 32>}, {transform_indices = @transform_1, window_bounds = array<i64: 2, 8, 32>}, {transform_indices = @transform_2, window_bounds = array<i64: 2, 8>}, {pipeline_mode = #tpu.pipeline_mode<synchronous>, transform_indices = @transform_3, window_bounds = array<i64: 32, 32>}, {pipeline_mode = #tpu.pipeline_mode<synchronous>, transform_indices = @transform_4, window_bounds = array<i64: 32, 32>}, {pipeline_mode = #tpu.pipeline_mode<synchronous>, transform_indices = @transform_5, window_bounds = array<i64: 1, 32>}, {transform_indices = @transform_6, window_bounds = array<i64: 2, 8>}]} {
    %c0 = arith.constant 0 : index
    %c0_0 = arith.constant 0 : index
    %c0_1 = arith.constant 0 : index
    %0 = vector.load %arg2[%c0, %c0_0, %c0_1] : memref<2x8x32xf32, #tpu.memory_space<vmem>>, vector<2x8x32xf32>
    %1 = vector.shape_cast %0 : vector<2x8x32xf32> to vector<16x32xf32>
    %c0_2 = arith.constant 0 : index
    %c0_3 = arith.constant 0 : index
    %2 = vector.load %arg4[%c0_2, %c0_3] : memref<32x32xf32, #tpu.memory_space<vmem>>, vector<32x32xf32>
    %cst = arith.constant dense<0.000000e+00> : vector<16x32xf32>
    %3 = tpu.matmul %1, %2, %cst {dimension_numbers = #tpu.dot_dimension_numbers<[1], [0], [0], [1], [0, 0, 1, 1], [], []>} : vector<16x32xf32>, vector<32x32xf32>, vector<16x32xf32> -> vector<16x32xf32>
    %c0_4 = arith.constant 0 : index
    %c0_5 = arith.constant 0 : index
    %4 = vector.load %arg1[%c0_4, %c0_5] : memref<2x32xf32, #tpu.memory_space<vmem>>, vector<2x32xf32>
    %c0_6 = arith.constant 0 : index
    %c0_7 = arith.constant 0 : index
    %5 = vector.load %arg5[%c0_6, %c0_7] : memref<32x32xf32, #tpu.memory_space<vmem>>, vector<32x32xf32>
    %cst_8 = arith.constant dense<0.000000e+00> : vector<2x32xf32>
    %6 = tpu.matmul %4, %5, %cst_8 {dimension_numbers = #tpu.dot_dimension_numbers<[1], [0], [0], [1], [0, 0, 1, 1], [], []>} : vector<2x32xf32>, vector<32x32xf32>, vector<2x32xf32> -> vector<2x32xf32>
    %7 = vector.shape_cast %3 : vector<16x32xf32> to vector<2x8x32xf32>
    %8 = vector.shape_cast %6 : vector<2x32xf32> to vector<2x1x32xf32>
    %9 = vector.broadcast %8 : vector<2x1x32xf32> to vector<2x8x32xf32>
    %10 = arith.addf %7, %9 : vector<2x8x32xf32>
    %11 = math.tanh %10 : vector<2x8x32xf32>
    %c0_9 = arith.constant 0 : index
    %c0_10 = arith.constant 0 : index
    %12 = vector.load %arg6[%c0_9, %c0_10] : memref<1x32xf32, #tpu.memory_space<vmem>>, vector<1x32xf32>
    %13 = vector.shape_cast %12 : vector<1x32xf32> to vector<1x1x32xf32>
    %14 = vector.broadcast %13 : vector<1x1x32xf32> to vector<2x8x32xf32>
    %15 = arith.mulf %11, %14 : vector<2x8x32xf32>
    %cst_11 = arith.constant dense<0.000000e+00> : vector<2x8xf32>
    %16 = vector.multi_reduction <add>, %15, %cst_11 [2] : vector<2x8x32xf32> to vector<2x8xf32>
    %c0_12 = arith.constant 0 : index
    %c0_13 = arith.constant 0 : index
    %17 = vector.load %arg3[%c0_12, %c0_13] : memref<2x8xf32, #tpu.memory_space<vmem>>, vector<2x8xf32>
    %cst_14 = arith.constant 0.000000e+00 : f32
    %18 = vector.broadcast %cst_14 : f32 to vector<2x8xf32>
    %19 = arith.cmpf one, %17, %18 : vector<2x8xf32>
    %cst_15 = arith.constant -1.000000e+30 : f32
    %20 = vector.broadcast %cst_15 : f32 to vector<2x8xf32>
    %21 = arith.select %19, %16, %20 : vector<2x8xi1>, vector<2x8xf32>
    %cst_16 = arith.constant dense<0xFF800000> : vector<2xf32>
    %22 = vector.multi_reduction <maximumf>, %21, %cst_16 [1] : vector<2x8xf32> to vector<2xf32>
    %23 = vector.shape_cast %22 : vector<2xf32> to vector<2x1xf32>
    %24 = vector.broadcast %23 : vector<2x1xf32> to vector<2x8xf32>
    %25 = arith.subf %21, %24 : vector<2x8xf32>
    %26 = math.exp %25 : vector<2x8xf32>
    %cst_17 = arith.constant dense<0.000000e+00> : vector<2xf32>
    %27 = vector.multi_reduction <add>, %26, %cst_17 [1] : vector<2x8xf32> to vector<2xf32>
    %28 = vector.shape_cast %27 : vector<2xf32> to vector<2x1xf32>
    %29 = math.log %28 : vector<2x1xf32>
    %30 = arith.addf %29, %23 : vector<2x1xf32>
    %31 = vector.broadcast %30 : vector<2x1xf32> to vector<2x8xf32>
    %32 = arith.subf %21, %31 : vector<2x8xf32>
    %c0_18 = arith.constant 0 : index
    %c0_19 = arith.constant 0 : index
    %33 = vector.load %arg7[%c0_18, %c0_19] : memref<2x8xf32, #tpu.memory_space<vmem>>, vector<2x8xf32>
    tpu.vector_store %arg7[%c0_18, %c0_19], %32 {strides = array<i32>} : memref<2x8xf32, #tpu.memory_space<vmem>>, vector<2x8xf32>,
    return
  }
  func.func @transform_0(%arg0: i32) -> (i32, i32) {
    %c0_i32 = arith.constant 0 : i32
    %c0_i32_0 = arith.constant 0 : i32
    return %arg0, %c0_i32 : i32, i32
  }
  func.func @transform_1(%arg0: i32) -> (i32, i32, i32) {
    %c0_i32 = arith.constant 0 : i32
    %c0_i32_0 = arith.constant 0 : i32
    %c0_i32_1 = arith.constant 0 : i32
    return %arg0, %c0_i32, %c0_i32_0 : i32, i32, i32
  }
  func.func @transform_2(%arg0: i32) -> (i32, i32) {
    %c0_i32 = arith.constant 0 : i32
    %c0_i32_0 = arith.constant 0 : i32
    return %arg0, %c0_i32 : i32, i32
  }
  func.func @transform_3(%arg0: i32) -> (i32, i32) {
    %c0_i32 = arith.constant 0 : i32
    %c0_i32_0 = arith.constant 0 : i32
    %c0_i32_1 = arith.constant 0 : i32
    return %c0_i32, %c0_i32_0 : i32, i32
  }
  func.func @transform_4(%arg0: i32) -> (i32, i32) {
    %c0_i32 = arith.constant 0 : i32
    %c0_i32_0 = arith.constant 0 : i32
    %c0_i32_1 = arith.constant 0 : i32
    return %c0_i32, %c0_i32_0 : i32, i32
  }
  func.func @transform_5(%arg0: i32) -> (i32, i32) {
    %c0_i32 = arith.constant 0 : i32
    %c0_i32_0 = arith.constant 0 : i32
    %c0_i32_1 = arith.constant 0 : i32
    return %c0_i32, %c0_i32_0 : i32, i32
  }
  func.func @transform_6(%arg0: i32) -> (i32, i32) {
    %c0_i32 = arith.constant 0 : i32
    %c0_i32_0 = arith.constant 0 : i32
    return %arg0, %c0_i32 : i32, i32
  }
}

</mosaic_0001>

<bundles_post_ra>
// kernel: tpu_custom_call.1
= control target key start
LH: loop header
LB: loop body
LE: loop exit
PB: predicated region body
PF: predicated region fallthrough
CT: control target
= control target key end

     0   :  { %11 = vsyncpa [#allocation3], 0  ;;  %s478_s0 = inlined_call_operand.hbm [shape: f32[2,32], index: 0, kind: input, shape index: {}]   ;;  %s479_s1 = inlined_call_operand.hbm [shape: f32[2,8,32], index: 1, kind: input, shape index: {}]   ;;  %s480_s2 = inlined_call_operand.hbm [shape: f32[2,8], index: 2, kind: input, shape index: {}]   ;;  %s481_s3 = inlined_call_operand.hbm [shape: f32[32,32], index: 3, kind: input, shape index: {}]   ;;  %s482_s4 = inlined_call_operand.hbm [shape: f32[32,32], index: 4, kind: input, shape index: {}]   ;;  %s483_s5 = inlined_call_operand.vmem [shape: f32[1,32], index: 5, kind: input, shape index: {}]   ;;  %s484_s6 = inlined_call_operand.hbm [shape: f32[2,8], index: 6, kind: output, shape index: {}]  }
   0x1   :  { %12 = vsyncpa [#allocation6], 0 }
   0x2   :  { %13 = vsyncpa [#allocation9], 0  ;;  %s30_s23 = sshll.u32 %s479_s1, 4  ;;  %s31_s23 = int_to_ptr.hbm [resolvable:$true] %s30_s23 }
   0x3   :  { %14 = vsyncpa [#allocation4], 0  ;;  %s406_s24 = smov [#allocation5]   ;;  %s54_s28 = sshll.u32 %s481_s3, 4  ;;  %s55_s28 = int_to_ptr.hbm [resolvable:$true] %s54_s28 }
   0x4   :  { %s32_s25 = sshll.u32 %s406_s24, 4  ;;  %s407_s29 = smov 128   ;;  %s33_s25 = int_to_ptr.vmem [resolvable:$true] %s32_s25 }
   0x5   :  { %s408_s30 = smov 8   ;;  %s409_s7 = smov [#allocation8]  }
   0x6   :  { %38 = dma.hbm_to_vmem [thread:$0]  %s31_s23, 256, %s33_s25, [#allocation6], %s407_s29, %s407_s29, %s408_s30  }
   0x7   :  { %s56_s8 = sshll.u32 %s409_s7, 4  ;;  %s20_s11 = sshll.u32 %s478_s0, 4  ;;  %s57_s8 = int_to_ptr.vmem [resolvable:$true] %s56_s8  ;;  %s21_s11 = int_to_ptr.hbm [resolvable:$true] %s20_s11 }
   0x8   :  { %62 = dma.hbm_to_vmem [thread:$0]  %s55_s28, 512, %s57_s8, [#allocation9], %s407_s29, %s407_s29, %s408_s30  }
   0x9   :  { %s44_s13 = sshll.u32 %s480_s2, 4  ;;  %s410_s14 = smov [#allocation2]   ;;  %s45_s13 = int_to_ptr.hbm [resolvable:$true] %s44_s13 }
   0xa   :  { %s22_s15 = sshll.u32 %s410_s14, 4  ;;  %s411_s3 = smov [#allocation7]   ;;  %s23_s15 = int_to_ptr.vmem [resolvable:$true] %s22_s15 }
   0xb   :  { %25 = dma.hbm_to_vmem [thread:$0]  %s21_s11, 32, %s23_s15, [#allocation3]  }
   0xc   :  { %s46_s16 = sshll.u32 %s411_s3, 4  ;;  %s67_s19 = sshll.u32 %s482_s4, 4  ;;  %s47_s16 = int_to_ptr.vmem [resolvable:$true] %s46_s16  ;;  %s68_s19 = int_to_ptr.hbm [resolvable:$true] %s67_s19 }
   0xd   :  { %49 = dma.hbm_to_vmem [thread:$0]  %s45_s13, 32, %s47_s16, [#allocation6]  }
   0xe   :  { %s412_s0 = smov [#allocation10]  }
   0xf   :  { %s69_s20 = sshll.u32 %s412_s0, 4  ;;  %s70_s20 = int_to_ptr.vmem [resolvable:$true] %s69_s20 }
  0x10   :  { %75 = dma.hbm_to_vmem [thread:$0]  %s68_s19, 512, %s70_s20, [#allocation9], %s407_s29, %s407_s29, %s408_s30  }
  0x11   :  { %398 = dma.done.wait [#allocation3], 32  }
  0x12   :  { %399 = vsyncadd [#allocation3], 4294967264 }
  0x13   :  { %400 = dma.done.wait [#allocation6], 288  }
  0x14   :  { %401 = vsyncadd [#allocation6], 4294967008 }
  0x15   :  { %402 = dma.done.wait [#allocation9], 1024  }
  0x16   :  { %403 = vsyncadd [#allocation9], 4294966272  ;;  %v103_v0 = vld [vmem:[#allocation8 + $0x18] sm:$0xff]  ;;  %v102_v2 = vld [vmem:[#allocation8 + $0x10] sm:$0xff]  ;;  %vm104_vm0 = vcmask 261120   ;;  %v188_v27 = vlaneseq  ;;  %vm192_vm1 = vcmask 1041409  }
  0x17   :  { %v138_v1 = vld [vmem:[#allocation10 + $0x18] sm:$0xff]  ;;  %233 = vmatpush.msra.mxu2 %v103_v0  ;;  %v137_v3 = vld [vmem:[#allocation10 + $0x10] sm:$0xff]  ;;  %123 = vmatpush.msra.mxu0 %v103_v0  ;;  %v101_v4 = vld [vmem:[#allocation8 + $0x8] sm:$0xff]  ;;  %vm196_vm3 = vcmask 58368   ;;  %s218_s24 = sshll.u32 %s484_s6, 4  ;;  %s219_s24 = int_to_ptr.hbm [resolvable:$true] %s218_s24 }
  0x18   :  { %154 = vmatpush.msra.mxu1 %v138_v1  ;;  %v136_v5 = vld [vmem:[#allocation10 + $0x8] sm:$0xff]  ;;  %v100_v6 = vld [vmem:[#allocation8] sm:$0xff]  ;;  %v99_v8 = vld [vmem:[#allocation5 + $0x8] sm:$0xff]  ;;  %v189_v28 = vand.u32 127, %v188_v27 }
  0x19   :  { %234 = vmatpush.msra.mxu2 %v102_v2  ;;  %124 = vmatpush.msra.mxu0 %v102_v2  ;;  %v135_v7 = vld [vmem:[#allocation10] sm:$0xff]  ;;  %v134_v9 = vld [vmem:[#allocation2] sm:$0x3]  ;;  %v98_v10 = vld [vmem:[#allocation5] sm:$0xff] }
  0x1a   :  { %155 = vmatpush.msra.mxu1 %v137_v3  ;;  %v245_v19 = vld [vmem:[%s483_s5] ss:$0 sm:$0xff]  ;;  %v184_v29 = vld [vmem:[#allocation7] sm:$0x3]  ;;  %s413_s5 = smov [#allocation11]  }
  0x1b   :  { %235 = vmatpush.msra.mxu2 %v101_v4  ;;  %125 = vmatpush.msra.mxu0 %v101_v4  ;;  %vm185_vm2 = vcmp.ne.f32.partialorder %v184_v29, 0.0  ;;  %s216_s21 = sshll.u32 %s413_s5, 4  ;;  %s217_s21 = int_to_ptr.vmem [resolvable:$true] %s216_s21 }
  0x1c   :  { %156 = vmatpush.msra.mxu1 %v136_v5 }
  0x1d   :  { %236 = vmatpush.msra.mxu2 %v100_v6  ;;  %126 = vmatpush.msra.mxu0 %v100_v6 }
  0x1e   :  { %157 = vmatpush.msra.mxu1 %v135_v7  ;;  %231 = vmatmul.msk.f32.vlgmr.msra.gmra.mxu2 %vm104_vm0, %v99_v8 }
  0x1f   :  { %232 = vmatmul.msk.f32.vlgmr.msra.gmra.mxu1 %vm104_vm0, %v134_v9  ;;  %230 = vmatmul.msk.f32.vlgmr.msra.gmra.mxu0 %vm104_vm0, %v98_v10 }
  0x9c   :  { %v159_v11 = vpop.f32.mrf.mxu1  ;;  %v128_v14 = vpop.f32.mrf.mxu0 }
  0x9d   :  { %v163_v12 = vrot.slane %v159_v11, 1  ;;  %v164_v13 = vperm.slane %v159_v11, 0 }
  0x9f   :  { %v168_v15 = vadd.f32 %v164_v13, %v128_v14  ;;  %v165_v16 = vperm.slane %v163_v12, 0 }
  0xa1   :  { %246 = vtanh.f32 %v168_v15  ;;  %v131_v17 = vpop.f32.mrf.mxu2 }
  0xa2   :  { %v169_v18 = vadd.f32 %v165_v16, %v131_v17 }
  0xa4   :  { %248 = vtanh.f32 %v169_v18 }
  0xa7   :  { %v247_v20 = vpop.eup %246 }
  0xa8   :  { %v176_v21 = vmul.f32 %v247_v20, %v245_v19 }
  0xaa   :  { %v178_v22 = vsel %vm104_vm0, %v176_v21, 0.0  ;;  %v249_v23 = vpop.eup %248 }
  0xab   :  { %179 = vadd.xlane.f32.xlu0 %v178_v22  ;;  %v177_v24 = vmul.f32 %v249_v23, %v245_v19 }
  0xad   :  { %v181_v25 = vsel %vm104_vm0, %v177_v24, 0.0 }
  0xb3   :  { %182 = vadd.xlane.f32.xlu0 %v181_v25 }
 0x11e   :  { %v180_v26 = vpop.xlane.xlu0 %179 }
 0x11f   :  { %v190_v31 = vperm.slane %v180_v26, %v189_v28 }
 0x126   :  { %v183_v30 = vpop.xlane.xlu0 %182 }
 0x127   :  { %v191_v32 = vperm.slane %v183_v30, %v189_v28 }
 0x129   :  { %v193_v33 = vsel %vm192_vm1, %v191_v32, %v190_v31 }
 0x12a   :  { %v195_v34 = vsel %vm185_vm2, %v193_v33, -1e+30 }
 0x12b   :  { %v197_v35 = vsel %vm196_vm3, %v195_v34, -inf }
 0x12c   :  { %198 = vmax.xlane.f32.xlu1 %v197_v35 }
 0x19f   :  { %v199_v36 = vpop.xlane.xlu1 %198 }
 0x1a0   :  { %v200_v37 = vsub.f32 %v195_v34, %v199_v36 }
 0x1a2   :  { %v201_v38 = vmul.f32 1.442695, %v200_v37 }
 0x1a4   :  { %250 = vpow2.f32 %v201_v38 }
 0x1aa   :  { %v251_v39 = vpop.eup %250 }
 0x1ab   :  { %v203_v40 = vsel %vm196_vm3, %v251_v39, 0.0 }
 0x1ac   :  { %204 = vadd.xlane.f32.xlu1 %v203_v40 }
 0x21f   :  { %v205_v41 = vpop.xlane.xlu1 %204 }
 0x220   :  { %252 = vlog2.f32 %v205_v41 }
 0x226   :  { %v253_v42 = vpop.eup %252 }
 0x227   :  { %v207_v43 = vmul.f32 0.6931472, %v253_v42 }
 0x229   :  { %v208_v44 = vadd.f32 %v207_v43, %v199_v36 }
 0x22b   :  { %v209_v45 = vsub.f32 %v195_v34, %v208_v44 }
 0x22d   :  { %210 = vst.msk [vmem:[#allocation11] sm:$0x3] %vm196_vm3, %v209_v45 }
 0x22e   :  { %221 = dma.vmem_to_hbm [thread:$0]  %s217_s21, 32, %s219_s24, [#allocation4]  }
 0x22f   :  { %404 = dma.done.wait [#allocation4], 32  }
 0x230   :  { %405 = vsyncadd [#allocation4], 4294967264 }
 0x231   :  { %226 = vsyncpa [#allocation3], 1 }
 0x232   :  { %227 = vsyncpa [#allocation6], 1 }
 0x233   :  { %228 = vsyncpa [#allocation9], 1 }
 0x234   :  { %229 = vsyncpa [#allocation4], 1 }

</bundles_post_ra>
